<compile_context>
chip_gen: v6e
topology: v6e:2x2x1
jax: 0.10.0
libtpu: 0.0.40
codegen_flags: <defaults>
</compile_context>

<pallas_src>
import functools

import jax
import jax.numpy as jnp
from jax.experimental import pallas as pl
from jax.experimental.pallas import tpu as pltpu

BN_EPS = 1e-5      # nn.BatchNorm1d default eps
NORM_EPS = 1e-12   # F.normalize default eps


def iscnet_kernel(x_ref, wbb_ref, wfc_ref, bias_ref, out_ref, acc_ref,
                  *, p, eps, inv_hw):
    """Fused backbone 1x1 conv+ReLU -> GeM (tiled over spatial) -> fc(+folded BN) -> L2 norm.

    Grid: (B, P // TP); axis 0 "parallel" (batch), axis 1 "arbitrary" (spatial reduction).

    x_ref:    [1, Cin, TP]      bf16, spatial tile on the lane axis
    wbb_ref:  [Cf, Cin]         bf16, synthetic backbone pointwise-conv weight (transposed)
    wfc_ref:  [Cf, Dp]          f32, fc weight with BN scale folded in, D padded to Dp
    bias_ref: [1, Dp]           f32, folded BN bias (zero in the padded columns)
    out_ref:  [1, 1, Dp]        f32, one L2-normalized embedding row per batch
    acc_ref:  [Cf, 128 or 1]    f32 VMEM scratch, GeM partial sum over spatial tiles
    """
    k = pl.program_id(1)

    @pl.when(k == 0)
    def _():
        acc_ref[...] = jnp.zeros_like(acc_ref)

    # --- synthetic backbone: pointwise conv as one MXU matmul (bf16 in, f32 acc) ---
    x_blk = x_ref[0]                                               # [Cin, TP] bf16
    feat = jnp.dot(wbb_ref[...], x_blk,
                   preferred_element_type=jnp.float32)             # [Cf, TP] f32, lane-dense

    # --- fused ReLU + GeM clamp: max(max(x, 0), eps) == max(x, eps) since eps > 0 ---
    g = jnp.maximum(feat, eps)

    # GeM power, specialized at trace time (p, eps are static floats).
    if p == 1.0:
        gp = g                                                     # no pow at all
    elif float(p).is_integer() and 1.0 < p <= 4.0:
        gp = g
        for _ in range(int(p) - 1):                                # repeated multiply, no EUP pow
            gp = gp * g
    else:
        gp = jnp.power(g, p)                                       # general fallback

    # Partial spatial sum for this tile (mean applied at finalize via static 1/P).
    tp = gp.shape[-1]
    acc_w = acc_ref.shape[-1]
    if acc_w == 1:
        # Fallback path (TP not a multiple of 128): XLU lane reduce per step.
        acc_ref[...] += jnp.sum(gp, axis=-1, keepdims=True)        # [Cf, 1]
    else:
        # Lane-dense accumulator: static, tile-aligned 128-wide slices summed on the VPU
        # (no per-step lane reduction, unmasked full-vreg stores to VMEM).
        part = gp[:, 0:acc_w]
        for j in range(1, tp // acc_w):
            part = part + gp[:, j * acc_w:(j + 1) * acc_w]
        acc_ref[...] += part                                       # [Cf, 128]

    @pl.when(k == pl.num_programs(1) - 1)
    def _():
        pooled = jnp.sum(acc_ref[...], axis=-1, keepdims=True) * inv_hw   # [Cf, 1]
        if p != 1.0:
            pooled = jnp.power(pooled, 1.0 / p)                    # only on the tiny pooled tensor

        # fc with BN folded in.  M == 1, so a VPU broadcast-multiply + sublane reduce is
        # cheaper than an MXU dispatch and avoids transposing the [Cf, 1] accumulator.
        y = jnp.sum(pooled * wfc_ref[...], axis=0, keepdims=True) + bias_ref[...]   # [1, Dp]

        # F.normalize(p=2, dim=1, eps=1e-12):  y / max(||y||, eps) == y * rsqrt(max(ssq, eps^2))
        ssq = jnp.sum(y * y, axis=-1, keepdims=True)
        inv_norm = jax.lax.rsqrt(jnp.maximum(ssq, NORM_EPS * NORM_EPS))
        out_ref[0] = y * inv_norm


def _pick_spatial_tile(P):
    """Largest 128-multiple divisor of P (capped at 1024); full extent otherwise."""
    for cand in (1024, 896, 768, 640, 512, 384, 256, 128):
        if P % cand == 0:
            return cand
    return P


@functools.partial(jax.jit, static_argnames=("p", "eps", "tile_p"))
def iscnet_forward(x_nchw, w_backbone, w_fc_t, bn_gamma, bn_beta, bn_mean, bn_var,
                   *, p=1.0, eps=1e-6, tile_p=None):
    """Wrapper: layout prep + BN folding + padding + pallas_call (glue only)."""
    B, Cin, H, W = x_nchw.shape
    P = H * W
    Cf, D = w_fc_t.shape
    assert w_backbone.shape == (Cin, Cf)
    assert Cf % 8 == 0, "backbone channels should be a multiple of 8 (sublane tile)"

    if tile_p is None:
        tile_p = _pick_spatial_tile(P)
    assert P % tile_p == 0, "spatial extent must be divisible by the spatial tile"
    acc_lanes = 128 if tile_p % 128 == 0 else 1

    # NCHW -> [B, Cin, P]: pure reshape (no transpose); spatial goes on the lane axis.
    # bf16 over HBM halves the dominant transfer; matmul accumulates in f32.
    x = x_nchw.reshape(B, Cin, P).astype(jnp.bfloat16)
    wbb_t = jnp.transpose(w_backbone).astype(jnp.bfloat16)          # [Cf, Cin]

    # Fold BatchNorm1d (eval mode) exactly into the fc weight and a bias vector.
    scale = (bn_gamma * jax.lax.rsqrt(bn_var + BN_EPS)).astype(jnp.float32)  # [D]
    bias = (bn_beta - bn_mean * scale).astype(jnp.float32)                    # [D]
    w_eff = w_fc_t.astype(jnp.float32) * scale[None, :]                       # [Cf, D]

    # Pad the output feature dim to a lane-dense multiple of 128 (unmasked stores);
    # padded weight columns / bias entries are zero so they contribute nothing.
    Dp = ((D + 127) // 128) * 128
    if Dp != D:
        w_eff = jnp.pad(w_eff, ((0, 0), (0, Dp - D)))
        bias = jnp.pad(bias, (0, Dp - D))
    bias2d = bias.reshape(1, Dp)

    kern = functools.partial(iscnet_kernel, p=float(p), eps=float(eps), inv_hw=1.0 / P)

    grid = (B, P // tile_p)  # batch "parallel" (megacore on v7x), spatial reduction "arbitrary"
    out = pl.pallas_call(
        kern,
        out_shape=jax.ShapeDtypeStruct((B, 1, Dp), jnp.float32),
        grid=grid,
        in_specs=[
            pl.BlockSpec((1, Cin, tile_p), lambda b, k: (b, 0, k)),
            pl.BlockSpec((Cf, Cin), lambda b, k: (0, 0)),
            pl.BlockSpec((Cf, Dp), lambda b, k: (0, 0)),
            pl.BlockSpec((1, Dp), lambda b, k: (0, 0)),
        ],
        out_specs=pl.BlockSpec((1, 1, Dp), lambda b, k: (b, 0, 0)),
        scratch_shapes=[pltpu.VMEM((Cf, acc_lanes), jnp.float32)],
        compiler_params=pltpu.CompilerParams(
            dimension_semantics=("parallel", "arbitrary")),
    )(x, wbb_t, w_eff, bias2d)

    return out.reshape(B, Dp)[:, :D]


def iscnet_reference(x_nchw, w_backbone, w_fc_t, bn_gamma, bn_beta, bn_mean, bn_var,
                     *, p=1.0, eps=1e-6):
    """Pure-JAX reference mirroring the PyTorch forward (BN left unfolded)."""
    B, Cin, H, W = x_nchw.shape
    # Match the kernel's bf16 quantization of the HBM inputs, compute in f32.
    x = x_nchw.reshape(B, Cin, H * W).astype(jnp.bfloat16).astype(jnp.float32)
    wbb = w_backbone.astype(jnp.bfloat16).astype(jnp.float32)
    feat = jnp.maximum(jnp.einsum("bcp,cf->bpf", x, wbb), 0.0)      # [B, P, Cf]
    pooled = jnp.power(jnp.mean(jnp.power(jnp.maximum(feat, eps), p), axis=1), 1.0 / p)
    y = pooled @ w_fc_t
    y = (y - bn_mean[None, :]) / jnp.sqrt(bn_var[None, :] + BN_EPS) * bn_gamma[None, :] \
        + bn_beta[None, :]
    nrm = jnp.sqrt(jnp.sum(y * y, axis=1, keepdims=True))
    return y / jnp.maximum(nrm, NORM_EPS)


if __name__ == "__main__":
    # Small shapes consistent with the forward pass.
    B, Cin, H, W = 2, 4, 16, 16     # input image (NCHW, like PyTorch)
    Cf = 32                         # backbone.feature_info.info[-1]['num_chs']
    FC_DIM = 64                     # fc_dim (kept small; default in module is 256)
    P_GEM, EPS_GEM = 1.0, 1e-6      # ISCNet defaults

    key = jax.random.PRNGKey(0)
    k_x, k_bb, k_fc, k_m, k_v = jax.random.split(key, 5)

    x = jax.random.normal(k_x, (B, Cin, H, W), dtype=jnp.float32)

    # Synthetic backbone 1x1-conv weight.
    w_backbone = jax.random.normal(k_bb, (Cin, Cf), dtype=jnp.float32) * 0.1

    # fc: xavier_normal_ init on a [FC_DIM, Cf] weight; kernel consumes the transpose.
    xavier_std = (2.0 / (Cf + FC_DIM)) ** 0.5
    w_fc = jax.random.normal(k_fc, (FC_DIM, Cf), dtype=jnp.float32) * xavier_std
    w_fc_t = w_fc.T

    # BatchNorm1d: gamma=1, beta=0 as in _init_params(); non-trivial running stats
    # (as after training) so the BN-folding path is actually exercised.
    bn_gamma = jnp.ones((FC_DIM,), jnp.float32)
    bn_beta = jnp.zeros((FC_DIM,), jnp.float32)
    bn_mean = jax.random.normal(k_m, (FC_DIM,), jnp.float32) * 0.05
    bn_var = jnp.abs(jax.random.normal(k_v, (FC_DIM,), jnp.float32)) * 0.1 + 0.9

    out = iscnet_forward(x, w_backbone, w_fc_t, bn_gamma, bn_beta, bn_mean, bn_var,
                         p=P_GEM, eps=EPS_GEM)
    out = jax.block_until_ready(out)

    ref = iscnet_reference(x, w_backbone, w_fc_t, bn_gamma, bn_beta, bn_mean, bn_var,
                           p=P_GEM, eps=EPS_GEM)
    assert out.shape == (B, FC_DIM)
    assert jnp.allclose(out, ref, atol=2e-5, rtol=2e-5), "mismatch vs reference"
    # output rows are L2-normalized
    assert jnp.allclose(jnp.linalg.norm(out, axis=1), 1.0, atol=1e-5)

    print("KERNEL_OK")
</pallas_src>

<mosaic_0001>
module attributes {stable_mosaic.version = 11 : i64} {
  func.func @iscnet_kernel(%arg0: i32, %arg1: i32, %arg2: memref<1x4x256xbf16, #tpu.memory_space<vmem>>, %arg3: memref<32x4xbf16, #tpu.memory_space<vmem>>, %arg4: memref<32x128xf32, #tpu.memory_space<vmem>>, %arg5: memref<1x128xf32, #tpu.memory_space<vmem>>, %arg6: memref<1x1x128xf32, #tpu.memory_space<vmem>>, %arg7: memref<32x128xf32, #tpu.memory_space<vmem>>) attributes {dimension_semantics = [#tpu.dimension_semantics<parallel>, #tpu.dimension_semantics<arbitrary>], iteration_bounds = array<i64: 2, 1>, scalar_prefetch = 0 : i64, scratch_operands = 1 : i64, tpu.core_type = #tpu.core_type<tc>, window_params = [{transform_indices = @transform_0, window_bounds = array<i64: 1, 4, 256>}, {pipeline_mode = #tpu.pipeline_mode<synchronous>, transform_indices = @transform_1, window_bounds = array<i64: 32, 4>}, {pipeline_mode = #tpu.pipeline_mode<synchronous>, transform_indices = @transform_2, window_bounds = array<i64: 32, 128>}, {pipeline_mode = #tpu.pipeline_mode<synchronous>, transform_indices = @transform_3, window_bounds = array<i64: 1, 128>}, {transform_indices = @transform_4, window_bounds = array<i64: 1, 1, 128>}]} {
    %c0_i32 = arith.constant 0 : i32
    %0 = arith.cmpi eq, %arg1, %c0_i32 : i32
    %1 = arith.extui %0 : i1 to i32
    %c0_i32_0 = arith.constant 0 : i32
    %2 = arith.cmpi ne, %1, %c0_i32_0 : i32
    scf.if %2 {
      %cst_12 = arith.constant 0.000000e+00 : f32
      %18 = vector.broadcast %cst_12 : f32 to vector<32x128xf32>
      %c0_13 = arith.constant 0 : index
      %c0_14 = arith.constant 0 : index
      %19 = vector.load %arg7[%c0_13, %c0_14] : memref<32x128xf32, #tpu.memory_space<vmem>>, vector<32x128xf32>
      tpu.vector_store %arg7[%c0_13, %c0_14], %18 {strides = array<i32>} : memref<32x128xf32, #tpu.memory_space<vmem>>, vector<32x128xf32>,
    } else {
    }
    %c0 = arith.constant 0 : index
    %c0_1 = arith.constant 0 : index
    %c0_2 = arith.constant 0 : index
    %3 = vector.load %arg2[%c0, %c0_1, %c0_2] : memref<1x4x256xbf16, #tpu.memory_space<vmem>>, vector<1x4x256xbf16>
    %4 = vector.shape_cast %3 : vector<1x4x256xbf16> to vector<4x256xbf16>
    %c0_3 = arith.constant 0 : index
    %c0_4 = arith.constant 0 : index
    %5 = vector.load %arg3[%c0_3, %c0_4] : memref<32x4xbf16, #tpu.memory_space<vmem>>, vector<32x4xbf16>
    %cst = arith.constant dense<0.000000e+00> : vector<32x256xf32>
    %6 = tpu.matmul %5, %4, %cst {dimension_numbers = #tpu.dot_dimension_numbers<[1], [0], [0], [1], [0, 0, 1, 1], [], []>} : vector<32x4xbf16>, vector<4x256xbf16>, vector<32x256xf32> -> vector<32x256xf32>
    %cst_5 = arith.constant 9.99999997E-7 : f32
    %7 = vector.broadcast %cst_5 : f32 to vector<32x256xf32>
    %8 = arith.maximumf %6, %7 : vector<32x256xf32>
    %9 = vector.extract_strided_slice %8 {offsets = [0, 0], sizes = [32, 128], strides = [1, 1]} : vector<32x256xf32> to vector<32x128xf32>
    %10 = vector.extract_strided_slice %8 {offsets = [0, 128], sizes = [32, 128], strides = [1, 1]} : vector<32x256xf32> to vector<32x128xf32>
    %11 = arith.addf %9, %10 : vector<32x128xf32>
    %c0_6 = arith.constant 0 : index
    %c0_7 = arith.constant 0 : index
    %12 = vector.load %arg7[%c0_6, %c0_7] : memref<32x128xf32, #tpu.memory_space<vmem>>, vector<32x128xf32>
    %13 = arith.addf %12, %11 : vector<32x128xf32>
    %c0_8 = arith.constant 0 : index
    %c0_9 = arith.constant 0 : index
    %14 = vector.load %arg7[%c0_8, %c0_9] : memref<32x128xf32, #tpu.memory_space<vmem>>, vector<32x128xf32>
    tpu.vector_store %arg7[%c0_8, %c0_9], %13 {strides = array<i32>} : memref<32x128xf32, #tpu.memory_space<vmem>>, vector<32x128xf32>,
    %c0_i32_10 = arith.constant 0 : i32
    %15 = arith.cmpi eq, %arg1, %c0_i32_10 : i32
    %16 = arith.extui %15 : i1 to i32
    %c0_i32_11 = arith.constant 0 : i32
    %17 = arith.cmpi ne, %16, %c0_i32_11 : i32
    scf.if %17 {
      %c0_12 = arith.constant 0 : index
      %c0_13 = arith.constant 0 : index
      %18 = vector.load %arg7[%c0_12, %c0_13] : memref<32x128xf32, #tpu.memory_space<vmem>>, vector<32x128xf32>
      %cst_14 = arith.constant dense<0.000000e+00> : vector<32xf32>
      %19 = vector.multi_reduction <add>, %18, %cst_14 [1] : vector<32x128xf32> to vector<32xf32>
      %20 = vector.shape_cast %19 : vector<32xf32> to vector<32x1xf32>
      %cst_15 = arith.constant 3.906250e-03 : f32
      %21 = vector.broadcast %cst_15 : f32 to vector<32x1xf32>
      %22 = arith.mulf %20, %21 : vector<32x1xf32>
      %c0_16 = arith.constant 0 : index
      %c0_17 = arith.constant 0 : index
      %23 = vector.load %arg4[%c0_16, %c0_17] : memref<32x128xf32, #tpu.memory_space<vmem>>, vector<32x128xf32>
      %24 = vector.broadcast %22 : vector<32x1xf32> to vector<32x128xf32>
      %25 = arith.mulf %24, %23 : vector<32x128xf32>
      %cst_18 = arith.constant dense<0.000000e+00> : vector<128xf32>
      %26 = vector.multi_reduction <add>, %25, %cst_18 [0] : vector<32x128xf32> to vector<128xf32>
      %27 = vector.shape_cast %26 : vector<128xf32> to vector<1x128xf32>
      %c0_19 = arith.constant 0 : index
      %c0_20 = arith.constant 0 : index
      %28 = vector.load %arg5[%c0_19, %c0_20] : memref<1x128xf32, #tpu.memory_space<vmem>>, vector<1x128xf32>
      %29 = arith.addf %27, %28 : vector<1x128xf32>
      %30 = arith.mulf %29, %29 : vector<1x128xf32>
      %cst_21 = arith.constant dense<0.000000e+00> : vector<1xf32>
      %31 = vector.multi_reduction <add>, %30, %cst_21 [1] : vector<1x128xf32> to vector<1xf32>
      %32 = vector.shape_cast %31 : vector<1xf32> to vector<1x1xf32>
      %cst_22 = arith.constant 1.000000e-24 : f32
      %33 = vector.broadcast %cst_22 : f32 to vector<1x1xf32>
      %34 = arith.maximumf %32, %33 : vector<1x1xf32>
      %35 = math.rsqrt %34 : vector<1x1xf32>
      %36 = vector.broadcast %35 : vector<1x1xf32> to vector<1x128xf32>
      %37 = arith.mulf %29, %36 : vector<1x128xf32>
      %c0_23 = arith.constant 0 : index
      %c0_24 = arith.constant 0 : index
      %c0_25 = arith.constant 0 : index
      %38 = vector.load %arg6[%c0_23, %c0_24, %c0_25] : memref<1x1x128xf32, #tpu.memory_space<vmem>>, vector<1x1x128xf32>
      %39 = vector.shape_cast %38 : vector<1x1x128xf32> to vector<1x128xf32>
      %40 = vector.shape_cast %37 : vector<1x128xf32> to vector<1x1x128xf32>
      tpu.vector_store %arg6[%c0_23, %c0_24, %c0_25], %40 {strides = array<i32>} : memref<1x1x128xf32, #tpu.memory_space<vmem>>, vector<1x1x128xf32>,
    } else {
    }
    return
  }
  func.func @transform_0(%arg0: i32, %arg1: i32) -> (i32, i32, i32) {
    %c0_i32 = arith.constant 0 : i32
    %c0_i32_0 = arith.constant 0 : i32
    return %arg0, %c0_i32, %arg1 : i32, i32, i32
  }
  func.func @transform_1(%arg0: i32, %arg1: i32) -> (i32, i32) {
    %c0_i32 = arith.constant 0 : i32
    %c0_i32_0 = arith.constant 0 : i32
    %c0_i32_1 = arith.constant 0 : i32
    return %c0_i32, %c0_i32_0 : i32, i32
  }
  func.func @transform_2(%arg0: i32, %arg1: i32) -> (i32, i32) {
    %c0_i32 = arith.constant 0 : i32
    %c0_i32_0 = arith.constant 0 : i32
    %c0_i32_1 = arith.constant 0 : i32
    return %c0_i32, %c0_i32_0 : i32, i32
  }
  func.func @transform_3(%arg0: i32, %arg1: i32) -> (i32, i32) {
    %c0_i32 = arith.constant 0 : i32
    %c0_i32_0 = arith.constant 0 : i32
    %c0_i32_1 = arith.constant 0 : i32
    return %c0_i32, %c0_i32_0 : i32, i32
  }
  func.func @transform_4(%arg0: i32, %arg1: i32) -> (i32, i32, i32) {
    %c0_i32 = arith.constant 0 : i32
    %c0_i32_0 = arith.constant 0 : i32
    %c0_i32_1 = arith.constant 0 : i32
    return %arg0, %c0_i32, %c0_i32_0 : i32, i32, i32
  }
}

</mosaic_0001>

<bundles_post_ra>
// kernel: iscnet_forward.1
= control target key start
LH: loop header
LB: loop body
LE: loop exit
PB: predicated region body
PF: predicated region fallthrough
CT: control target
= control target key end

     0   :  { %9 = vsyncpa [#allocation4], 0  ;;  %s780_s0 = inlined_call_operand.vmem [shape: bf16[2,4,256], index: 0, kind: input, shape index: {}]   ;;  %s781_s1 = inlined_call_operand.vmem [shape: bf16[32,4], index: 1, kind: input, shape index: {}]   ;;  %s782_s2 = inlined_call_operand.vmem [shape: f32[32,128], index: 2, kind: input, shape index: {}]   ;;  %s783_s3 = inlined_call_operand.vmem [shape: f32[1,128], index: 3, kind: input, shape index: {}]   ;;  %s784_s4 = inlined_call_operand.hbm [shape: f32[2,1,128], index: 4, kind: output, shape index: {}]  }
   0x1   :  { %11 = vsyncpa [#allocation4 + $0x1], 0  ;;  %s660_s15 = smov 0   ;;  %s662_s16 = smov 0  }
   0x2   :  { %s664_s17 = smov 0   ;;  %s666_s18 = smov 0  }
   0x3   :  { %s668_s19 = smov 0   ;;  %s670_s20 = smov 0  }
   0x4 LB: > { %s476_s21 = sadd.s32 4294967295, %s631_s20   ;;  %s477_s22 = sadd.s32 4294967294, %s631_s20   ;;  %s631_s20 = sphi %s670_s20, %s17_s20   ;;  %s627_s19 = sphi %s668_s19, %s791_s19   ;;  %s623_s18 = sphi %s666_s18, %s790_s18   ;;  %s619_s17 = sphi %s664_s17, %s789_s17   ;;  %s615_s16 = sphi %s662_s16, %s788_s16   ;;  %s611_s15 = sphi %s660_s15, %s787_s15  }
   0x5   : > { %s29_s23 = sadd.s32 1, %s627_s19  ;;  %s127_s24 = sadd.s32 1, %s619_s17 }
   0x6   : > { %p31_p0 = scmp.ge.s32.totalorder %s29_s23, 2  ;;  %p137_p1 = scmp.ne.s32.totalorder %s619_s17, %s615_s16 }
   0x7   : > { %p138_p2 = scmp.eq.s32.totalorder %s476_s21, 1  ;;  %p143_p3 = scmp.ne.s32.totalorder %s615_s16, %s611_s15 }
   0x8   : > { %s793_s23 = smov (%p31_p0, %s29_s23), 0  ;;  %p144_p5 = scmp.eq.s32.totalorder %s477_s22, 1 }
   0x9   : > { %p700_p4 = por %p138_p2, %p137_p1  ;;  %s124_s26 = ssub.s32 %s627_s19, %s793_s23 }
   0xa   : > { %p480_p6 = scmp.ge.s32.totalorder %s631_s20, 1  ;;  %p125_p7 = scmp.eq.s32.totalorder %s124_s26, 0 }
   0xb   : > { %p707_p8 = por %p144_p5, %p143_p3  ;;  %p184_p9 = scmp.lt.s32.totalorder %s631_s20, 3 }
   0xc   : > { %s713_s28 = scalar_select %p125_p7, %s619_s17, %s127_s24  }
   0xd   : > { %p185_p10 = pnand %p480_p6, %p184_p9 }
   0xe   : > { %p214_p11 = scmp.lt.s32.totalorder (!%p185_p10), %s623_s18, 1  ;;  %s211_s6 = sand.u32 (!%p185_p10), 1, %s615_s16  }
   0xf   : > { %188 = sbr.rel (%p185_p10) target bundleno = 568 (0x238), region = 36  ;;  %s212_s8 = scalar_lea.vmem (!%p185_p10), [#allocation3], %s211_s6 }
  0x10   : > { %s407_s9 = sshll.u32 (!%p185_p10), %s212_s8, 4  ;;  %s395_s13 = scalar_lea.sflag (!%p185_p10), [#allocation4], %s211_s6  ;;  %s408_s9 = int_to_ptr.vmem [resolvable:$true] %s407_s9 }
  0x11   : > { %s555_s14 = scalar_lea.vmem (!%p185_p10), %s408_s9, 16  ;;  %s634_s21 = smov (!%p185_p10), [#allocation3]  }
  0x12   : > { %p556_p12 = scmp.ne.s32.totalorder (!%p185_p10), %s408_s9, %s555_s14  ;;  %s559_s22 = sshll.u32 (!%p185_p10), %s634_s21, 4  ;;  %s560_s22 = int_to_ptr.vmem [resolvable:$false] %s559_s22 }
  0x13   : > { %p562_p1 = scmp.lt.s32.totalorder (!%p185_p10), %s408_s9, %s560_s22 }
  0x14   : > { %v633_v0 = vmov 0   ;;  %s215_s29 = scalar_select %p214_p11, %s623_s18, 1  ;;  %vm263_vm0 = vcmask 1041408   ;;  %v551_v4 = vld [vmem:[%s781_s1] sm:$0xff]   ;;  %v552_v5 = vld [vmem:[%s781_s1 + $0x8] sm:$0xff]   ;;  %vm256_vm1 = vcmask 31744  }
  0x15   : > { %302 = vmatprep.mubr.bf16.mxu0 %v633_v0  ;;  %312 = vmatprep.mubr.bf16.mxu1 %v633_v0  ;;  %v366_v29 = vld [vmem:[%s782_s2] sm:$0xff]  ;;  %v367_v31 = vld [vmem:[%s782_s2 + $0x8] sm:$0xff]  ;;  %v368_v35 = vld [vmem:[%s782_s2 + $0x10] sm:$0xff]  ;;  %vm386_vm2 = vcmask 1040384   ;;  %p557_p13 = pnand %p556_p12, %p700_p4 }
  0x16   : > { %s492_s30 = sshll.u32 %s215_s29, 2  ;;  %v369_v39 = vld [vmem:[%s782_s2 + $0x18] sm:$0xff]  ;;  %v383_v50 = vld [vmem:[%s783_s3] sm:$0x1] }
  0x17   : > { %s221_s7 = scalar_lea.vmem %s780_s0, %s492_s30  ;;  %p558_p0 = pneg %p557_p13 }
  0x18   : > { %v485_v1 = vld.sshfl [vmem:[%s221_s7] sm:$0x33 pattern:$0x76325410]  ;;  %s489_s7 = sshll.u32 %s623_s18, 4  ;;  %s561_s18 = scalar_lea.vmem %s560_s22, 32 }
  0x19   : > { %v255_v2 = vcombine.high %v485_v1, %v485_v1  ;;  %v265_v3 = vsel %vm263_vm0, %v485_v1, 0  ;;  %s405_s12 = scalar_lea.hbm %s784_s4, %s489_s7  ;;  %p563_p2 = scmp.lt.s32.totalorder %s561_s18, %s555_s14 }
  0x1b   : > { %486 = vmatprep.subr.msk.bf16.mxu0 %vm263_vm0, %v255_v2  ;;  %493 = vmatprep.subr.msk.bf16.mxu1 %vm263_vm0, %v255_v2  ;;  %p564_p3 = por %p563_p2, %p562_p1 }
  0x1c   : > { %285 = vmatpush1.bf16.msra.mxu0 %v265_v3  ;;  %494 = vmatpush1.bf16.msra.mxu1 %v265_v3 }
  0x1d   : > { %p565_p5 = pnand %p564_p3, %p558_p0 }
  0x1f   : > { %487 = vmatmul.mubr.msk.bf16.vlgmr.msra.gmra.mxu0 %vm256_vm1, %v551_v4  ;;  %488 = vmatmul.mubr.msk.bf16.vlgmr.msra.gmra.mxu1 %vm256_vm1, %v552_v5 }
  0xdf   : > { %v304_v6 = vpop.f32.mrf.mxu0  ;;  %v314_v7 = vpop.f32.mrf.mxu1 }
  0xe0   : > { %v327_v8 = vmax.f32 %v314_v7, 1e-06  ;;  %v323_v11 = vmax.f32 %v304_v6, 1e-06 }
  0xe1   : > { %v306_v9 = vpop.f32.mrf.mxu0  ;;  %v316_v10 = vpop.f32.mrf.mxu1 }
  0xe2   : > { %v324_v12 = vmax.f32 %v306_v9, 1e-06  ;;  %v328_v13 = vmax.f32 %v316_v10, 1e-06 }
  0xe3   : > { %v308_v14 = vpop.f32.mrf.mxu0  ;;  %v318_v15 = vpop.f32.mrf.mxu1 }
  0xe4   : > { %v333_v16 = vadd.f32 %v328_v13, %v327_v8  ;;  %v331_v17 = vadd.f32 %v324_v12, %v323_v11  ;;  %v325_v18 = vmax.f32 %v308_v14, 1e-06  ;;  %v329_v21 = vmax.f32 %v318_v15, 1e-06 }
  0xe5   : > { %v310_v19 = vpop.f32.mrf.mxu0  ;;  %v320_v20 = vpop.f32.mrf.mxu1 }
  0xe6   : > { %v326_v22 = vmax.f32 %v310_v19, 1e-06  ;;  %v330_v23 = vmax.f32 %v320_v20, 1e-06  ;;  %358 = vadd.xlane.f32.xlu1 %v333_v16  ;;  %354 = vadd.xlane.f32.xlu0 %v331_v17 }
  0xe8   : > { %v334_v24 = vadd.f32 %v330_v23, %v329_v21  ;;  %v332_v25 = vadd.f32 %v326_v22, %v325_v18 }
  0xea   : > { %360 = vadd.xlane.f32.xlu1 %v334_v24  ;;  %356 = vadd.xlane.f32.xlu0 %v332_v25 }
 0x16f   : > { %v359_v26 = vpop.xlane.xlu1 %358  ;;  %v355_v27 = vpop.xlane.xlu0 %354 }
 0x170   : > { %v362_v28 = vmul.f32 0.00390625, %v355_v27  ;;  %v364_v33 = vmul.f32 0.00390625, %v359_v26 }
 0x172   : > { %v370_v36 = vmul.f32 %v366_v29, %v362_v28  ;;  %v372_v40 = vmul.f32 %v368_v35, %v364_v33 }
 0x173   : > { %v361_v30 = vpop.xlane.xlu1 %360  ;;  %v357_v32 = vpop.xlane.xlu0 %356 }
 0x174   : > { %v363_v34 = vmul.f32 0.00390625, %v357_v32  ;;  %v365_v37 = vmul.f32 0.00390625, %v361_v30 }
 0x176   : > { %v371_v38 = vmul.f32 %v367_v31, %v363_v34  ;;  %v373_v42 = vmul.f32 %v369_v39, %v365_v37 }
 0x178   : > { %v374_v41 = vadd.f32 %v371_v38, %v370_v36 }
 0x17a   : > { %v375_v43 = vadd.f32 %v374_v41, %v372_v40 }
 0x17c   : > { %v376_v44 = vadd.f32 %v375_v43, %v373_v42 }
 0x17e   : > { %v377_v45 = vrot.slane %v376_v44, 4 }
 0x180   : > { %v378_v46 = vadd.f32 %v377_v45, %v376_v44 }
 0x182   : > { %v379_v47 = vrot.slane %v378_v46, 2 }
 0x184   : > { %v380_v48 = vadd.f32 %v379_v47, %v378_v46 }
 0x186   : > { %v381_v49 = vrot.slane %v380_v48, 1 }
 0x188   : > { %v382_v51 = vadd.f32 %v381_v49, %v380_v48 }
 0x18a   : > { %v384_v52 = vadd.f32 %v383_v50, %v382_v51 }
 0x18c   : > { %v385_v53 = vmul.f32 %v384_v52, %v384_v52 }
 0x18e   : > { %v387_v54 = vsel %vm386_vm2, %v385_v53, 0.0 }
 0x18f   : > { %388 = vadd.xlane.f32.xlu0 %v387_v54 }
 0x218   : > { %v389_v55 = vpop.xlane.xlu0 %388 }
 0x219   : > { %v390_v56 = vmax.f32 %v389_v55, 1e-24 }
 0x21b   : > { %553 = vrsqrt.f32 %v390_v56 }
 0x228   : > { %v554_v57 = vpop.eup %553 }
 0x229   : > { %v392_v58 = vmul.f32 %v554_v57, %v384_v52 }
 0x22b   : > { %393 = vst [vmem:[%s212_s8] sm:$0x1] %v392_v58 }
 0x22c   : > { %568 = shalt.err (!%p565_p5)
}
 0x22d   : > { %s569_s24 = scalar_lea.hbm %s405_s12, 16  ;;  %s573_s30 = scalar_lea.hbm %s784_s4, 32 }
 0x22e   : > { %p570_p6 = scmp.ne.s32.totalorder %s405_s12, %s569_s24  ;;  %p574_p10 = scmp.lt.s32.totalorder %s405_s12, %s784_s4 }
 0x22f   : > { %p575_p11 = scmp.lt.s32.totalorder %s573_s30, %s569_s24 }
 0x230   : > { %p571_p7 = pnand %p570_p6, %p700_p4 }
 0x231   : > { %p576_p12 = por %p575_p11, %p574_p10 }
 0x232   : > { %p572_p9 = pneg %p571_p7 }
 0x234   : > { %p577_p13 = pnand %p576_p12, %p572_p9 }
 0x236   : > { %580 = shalt.err (!%p577_p13)
}
 0x237   : > { %495 = dma.vmem_to_hbm [thread:$0]  (%p700_p4), %s408_s9, 16, %s405_s12, %s395_s13  }
 0x238 PF: > { %p501_p0 = scmp.ge.s32.totalorder %s631_s20, 2  ;;  %s419_s7 = sand.u32 1, %s611_s15  }
 0x239   : > { %s420_s8 = scalar_lea.sflag [#allocation4], %s419_s7 }
 0x23a   : > { %p498_p1 = pnand %p501_p0, %p707_p8 }
 0x23c   : > { %p499_p2 = pneg %p498_p1 }
 0x23e   : > { %606 = dma.done.wait (%p499_p2), %s420_s8, 16  }
 0x23f   : > { %608 = vsyncadd (%p499_p2), %s420_s8, 4294967280  ;;  %s17_s20 = sadd.s32 1, %s631_s20   ;;  %s787_s15 = smov %s615_s16 }
 0x240   : > { %p14_p3 = scmp.ge.s32.totalorder %s17_s20, 4   ;;  %s788_s16 = smov %s619_s17 }
 0x241   : > { %s789_s17 = smov %s713_s28  ;;  %s790_s18 = smov %s627_s19 }
 0x242   : > { %s791_s19 = smov %s793_s23  ;;  %16 = sbr.rel (!%p14_p3) target bundleno = 4 (0x4), region = 79 }
 0x247   :  { %424 = vsyncpa [#allocation4], 1 }
 0x248   :  { %426 = vsyncpa [#allocation4 + $0x1], 1 }

</bundles_post_ra>
